<compile_context>
chip_gen: v5e
topology: v5e:2x2
jax: 0.10.0
libtpu: 0.0.40
codegen_flags: <defaults>
</compile_context>

<pallas_src>
import jax
import jax.numpy as jnp
from jax import lax
from jax.experimental import pallas as pl
from jax.experimental.pallas import tpu as pltpu


def gmf_kernel(uid_ref, iid_ref,          # (1, tb) int32 id blocks (lane-dense)
               user_t_ref, item_t_ref,    # (D, NU) / (D, NI) transposed tables (VMEM-resident)
               w_ref, b_ref,              # (1, D) weight row in VMEM, (1,) bias in SMEM
               out_ref):                  # (1, tb) lane-dense output block
    d, nu = user_t_ref.shape
    _, ni = item_t_ref.shape
    tb = out_ref.shape[1]

    uid = uid_ref[...]                    # (1, tb)
    iid = iid_ref[...]

    # Transposed one-hot selectors: table index on sublanes, batch on lanes.
    # (1, tb) broadcasts over sublanes -> cheap VPU compare, no cross-lane moves.
    u_oh = (lax.broadcasted_iota(jnp.int32, (nu, tb), 0) == uid).astype(user_t_ref.dtype)
    i_oh = (lax.broadcasted_iota(jnp.int32, (ni, tb), 0) == iid).astype(item_t_ref.dtype)

    # Embedding gather on the MXU: (D, N) @ (N, tb) -> (D, tb).  Exact (one-hot).
    u_t = jnp.dot(user_t_ref[...], u_oh, preferred_element_type=jnp.float32)
    i_t = jnp.dot(item_t_ref[...], i_oh, preferred_element_type=jnp.float32)

    pv_t = u_t * i_t                      # (D, tb)  VPU elementwise

    # (1, D) @ (D, tb) -> (1, tb) lane-dense logits; scalar bias from SMEM; sigmoid on EUP.
    logits = jnp.dot(w_ref[...], pv_t, preferred_element_type=jnp.float32) + b_ref[0]
    out_ref[...] = jax.nn.sigmoid(logits)


def gmf_forward(ids, user_tab, item_tab, w, b, *, tb=256):
    """ids: (B, 2) int; user_tab: (NU, D); item_tab: (NI, D); w: (1, D); b: (1,)."""
    B = ids.shape[0]
    NU, D = user_tab.shape
    NI, _ = item_tab.shape

    # Tables are held VMEM-resident (constant index_map across the grid).
    table_bytes = (NU + NI) * D * 4
    assert table_bytes <= 16 * 1024 * 1024, (
        "embedding tables too large for the VMEM-resident one-hot gather path")
    # TODO(synk): for tables that do not fit in VMEM, fall back to an HBM
    # scalar-prefetch DMA gather (memory_space=pl.ANY + pltpu.make_async_copy).

    # Clamp ids (guards OOB like JAX gather) and pad batch to a tile multiple.
    Bp = ((B + tb - 1) // tb) * tb
    uid = jnp.clip(ids[:, 0].astype(jnp.int32), 0, NU - 1)
    iid = jnp.clip(ids[:, 1].astype(jnp.int32), 0, NI - 1)
    if Bp != B:
        uid = jnp.pad(uid, (0, Bp - B))
        iid = jnp.pad(iid, (0, Bp - B))
    uid = uid.reshape(1, Bp)
    iid = iid.reshape(1, Bp)

    user_t = user_tab.astype(jnp.float32).T       # (D, NU)
    item_t = item_tab.astype(jnp.float32).T       # (D, NI)
    w_row = w.astype(jnp.float32).reshape(1, D)
    b_vec = b.astype(jnp.float32).reshape(1)

    flops = 2 * Bp * D * (NU + NI) + 3 * Bp * D   # one-hot gathers + mul + projection
    bytes_accessed = ((NU + NI) * D * 4           # tables (fetched once, resident)
                      + 2 * Bp * 4                # ids
                      + Bp * 4                    # output
                      + D * 4 + 4)                # weight + bias

    out = pl.pallas_call(
        gmf_kernel,
        out_shape=jax.ShapeDtypeStruct((1, Bp), jnp.float32),   # lane-dense slab
        grid_spec=pltpu.PrefetchScalarGridSpec(
            num_scalar_prefetch=0,
            grid=(Bp // tb,),
            in_specs=[
                pl.BlockSpec((1, tb), lambda t: (0, t)),        # uid block
                pl.BlockSpec((1, tb), lambda t: (0, t)),        # iid block
                pl.BlockSpec((D, NU), lambda t: (0, 0)),        # user table^T (resident)
                pl.BlockSpec((D, NI), lambda t: (0, 0)),        # item table^T (resident)
                pl.BlockSpec((1, D), lambda t: (0, 0)),         # weight row
                pl.BlockSpec(memory_space=pltpu.MemorySpace.SMEM),  # bias scalar
            ],
            out_specs=pl.BlockSpec((1, tb), lambda t: (0, t)),
        ),
        compiler_params=pltpu.CompilerParams(
            dimension_semantics=("parallel",)),
        cost_estimate=pl.CostEstimate(
            flops=flops,
            transcendentals=Bp,          # sigmoid
            bytes_accessed=bytes_accessed),
    )(uid, iid, user_t, item_t, w_row, b_vec)

    # (1, Bp) -> (Bp, 1) is a pure flatten/unflatten (same row-major order).
    return out.reshape(Bp, 1)[:B]


def gmf_reference(ids, user_tab, item_tab, w, b):
    u = user_tab[ids[:, 0]]
    it = item_tab[ids[:, 1]]
    pv = u * it
    return jax.nn.sigmoid(pv @ w.T + b)


if __name__ == "__main__":
    num_users, num_items, latent_dim = 64, 64, 32
    batch, tile = 512, 256                 # 2 grid steps -> both v7x TCs get work

    key = jax.random.PRNGKey(0)
    k_u, k_i, k_w, k_b, k_uid, k_iid = jax.random.split(key, 6)

    # Parameters laid out like nn.Embedding / nn.Linear (weight (1, D), bias (1,)).
    user_tab = jax.random.normal(k_u, (num_users, latent_dim), dtype=jnp.float32)
    item_tab = jax.random.normal(k_i, (num_items, latent_dim), dtype=jnp.float32)
    bound = 1.0 / (latent_dim ** 0.5)
    w = jax.random.uniform(k_w, (1, latent_dim), jnp.float32, -bound, bound)
    b = jax.random.uniform(k_b, (1,), jnp.float32, -bound, bound)

    # Example inputs: (B, 2) int ids  [user_id, item_id]
    ids = jnp.stack(
        [jax.random.randint(k_uid, (batch,), 0, num_users),
         jax.random.randint(k_iid, (batch,), 0, num_items)],
        axis=1).astype(jnp.int32)

    out = gmf_forward(ids, user_tab, item_tab, w, b, tb=tile)
    out = jax.block_until_ready(out)

    ref = gmf_reference(ids, user_tab, item_tab, w, b)
    assert out.shape == (batch, 1)
    assert jnp.allclose(out, ref, atol=1e-5, rtol=1e-5), (out, ref)

    print("KERNEL_OK")
</pallas_src>

<mosaic_0001>
module attributes {stable_mosaic.version = 11 : i64} {
  func.func @gmf_kernel(%arg0: i32, %arg1: memref<1x256xi32, #tpu.memory_space<vmem>>, %arg2: memref<1x256xi32, #tpu.memory_space<vmem>>, %arg3: memref<32x64xf32, #tpu.memory_space<vmem>>, %arg4: memref<32x64xf32, #tpu.memory_space<vmem>>, %arg5: memref<1x32xf32, #tpu.memory_space<vmem>>, %arg6: memref<1xf32, #tpu.memory_space<smem>>, %arg7: memref<1x256xf32, #tpu.memory_space<vmem>>) attributes {dimension_semantics = [#tpu.dimension_semantics<parallel>], iteration_bounds = array<i64: 2>, scalar_prefetch = 0 : i64, scratch_operands = 0 : i64, tpu.core_type = #tpu.core_type<tc>, window_params = [{transform_indices = @transform_0, window_bounds = array<i64: 1, 256>}, {transform_indices = @transform_1, window_bounds = array<i64: 1, 256>}, {pipeline_mode = #tpu.pipeline_mode<synchronous>, transform_indices = @transform_2, window_bounds = array<i64: 32, 64>}, {pipeline_mode = #tpu.pipeline_mode<synchronous>, transform_indices = @transform_3, window_bounds = array<i64: 32, 64>}, {pipeline_mode = #tpu.pipeline_mode<synchronous>, transform_indices = @transform_4, window_bounds = array<i64: 1, 32>}, {transform_indices = @transform_5, window_bounds = array<i64: 1>}, {transform_indices = @transform_6, window_bounds = array<i64: 1, 256>}]} {
    %c0 = arith.constant 0 : index
    %c0_0 = arith.constant 0 : index
    %0 = vector.load %arg1[%c0, %c0_0] : memref<1x256xi32, #tpu.memory_space<vmem>>, vector<1x256xi32>
    %c0_1 = arith.constant 0 : index
    %c0_2 = arith.constant 0 : index
    %1 = vector.load %arg2[%c0_1, %c0_2] : memref<1x256xi32, #tpu.memory_space<vmem>>, vector<1x256xi32>
    %2 = tpu.iota {dimensions = array<i32: 0>} : vector<64x256xi32>
    %3 = vector.broadcast %0 : vector<1x256xi32> to vector<64x256xi32>
    %4 = arith.cmpi eq, %2, %3 : vector<64x256xi32>
    %5 = arith.extui %4 : vector<64x256xi1> to vector<64x256xi32>
    %6 = arith.sitofp %5 : vector<64x256xi32> to vector<64x256xf32>
    %7 = tpu.iota {dimensions = array<i32: 0>} : vector<64x256xi32>
    %8 = vector.broadcast %1 : vector<1x256xi32> to vector<64x256xi32>
    %9 = arith.cmpi eq, %7, %8 : vector<64x256xi32>
    %10 = arith.extui %9 : vector<64x256xi1> to vector<64x256xi32>
    %11 = arith.sitofp %10 : vector<64x256xi32> to vector<64x256xf32>
    %c0_3 = arith.constant 0 : index
    %c0_4 = arith.constant 0 : index
    %12 = vector.load %arg3[%c0_3, %c0_4] : memref<32x64xf32, #tpu.memory_space<vmem>>, vector<32x64xf32>
    %cst = arith.constant dense<0.000000e+00> : vector<32x256xf32>
    %13 = tpu.matmul %12, %6, %cst {dimension_numbers = #tpu.dot_dimension_numbers<[1], [0], [0], [1], [0, 0, 1, 1], [], []>} : vector<32x64xf32>, vector<64x256xf32>, vector<32x256xf32> -> vector<32x256xf32>
    %c0_5 = arith.constant 0 : index
    %c0_6 = arith.constant 0 : index
    %14 = vector.load %arg4[%c0_5, %c0_6] : memref<32x64xf32, #tpu.memory_space<vmem>>, vector<32x64xf32>
    %cst_7 = arith.constant dense<0.000000e+00> : vector<32x256xf32>
    %15 = tpu.matmul %14, %11, %cst_7 {dimension_numbers = #tpu.dot_dimension_numbers<[1], [0], [0], [1], [0, 0, 1, 1], [], []>} : vector<32x64xf32>, vector<64x256xf32>, vector<32x256xf32> -> vector<32x256xf32>
    %16 = arith.mulf %13, %15 : vector<32x256xf32>
    %c0_8 = arith.constant 0 : index
    %c0_9 = arith.constant 0 : index
    %17 = vector.load %arg5[%c0_8, %c0_9] : memref<1x32xf32, #tpu.memory_space<vmem>>, vector<1x32xf32>
    %cst_10 = arith.constant dense<0.000000e+00> : vector<1x256xf32>
    %18 = tpu.matmul %17, %16, %cst_10 {dimension_numbers = #tpu.dot_dimension_numbers<[1], [0], [0], [1], [0, 0, 1, 1], [], []>} : vector<1x32xf32>, vector<32x256xf32>, vector<1x256xf32> -> vector<1x256xf32>
    %c0_11 = arith.constant 0 : index
    %19 = memref.load %arg6[%c0_11] : memref<1xf32, #tpu.memory_space<smem>>
    %20 = vector.broadcast %19 : f32 to vector<1x256xf32>
    %21 = arith.addf %18, %20 : vector<1x256xf32>
    %22 = arith.negf %21 : vector<1x256xf32>
    %23 = math.exp %22 : vector<1x256xf32>
    %cst_12 = arith.constant 1.000000e+00 : f32
    %24 = vector.broadcast %cst_12 : f32 to vector<1x256xf32>
    %25 = arith.addf %24, %23 : vector<1x256xf32>
    %26 = arith.divf %24, %25 : vector<1x256xf32>
    %c0_13 = arith.constant 0 : index
    %c0_14 = arith.constant 0 : index
    %27 = vector.load %arg7[%c0_13, %c0_14] : memref<1x256xf32, #tpu.memory_space<vmem>>, vector<1x256xf32>
    tpu.vector_store %arg7[%c0_13, %c0_14], %26 {strides = array<i32>} : memref<1x256xf32, #tpu.memory_space<vmem>>, vector<1x256xf32>,
    return
  }
  func.func @transform_0(%arg0: i32) -> (i32, i32) {
    %c0_i32 = arith.constant 0 : i32
    %c0_i32_0 = arith.constant 0 : i32
    return %c0_i32, %arg0 : i32, i32
  }
  func.func @transform_1(%arg0: i32) -> (i32, i32) {
    %c0_i32 = arith.constant 0 : i32
    %c0_i32_0 = arith.constant 0 : i32
    return %c0_i32, %arg0 : i32, i32
  }
  func.func @transform_2(%arg0: i32) -> (i32, i32) {
    %c0_i32 = arith.constant 0 : i32
    %c0_i32_0 = arith.constant 0 : i32
    %c0_i32_1 = arith.constant 0 : i32
    return %c0_i32, %c0_i32_0 : i32, i32
  }
  func.func @transform_3(%arg0: i32) -> (i32, i32) {
    %c0_i32 = arith.constant 0 : i32
    %c0_i32_0 = arith.constant 0 : i32
    %c0_i32_1 = arith.constant 0 : i32
    return %c0_i32, %c0_i32_0 : i32, i32
  }
  func.func @transform_4(%arg0: i32) -> (i32, i32) {
    %c0_i32 = arith.constant 0 : i32
    %c0_i32_0 = arith.constant 0 : i32
    %c0_i32_1 = arith.constant 0 : i32
    return %c0_i32, %c0_i32_0 : i32, i32
  }
  func.func @transform_5(%arg0: i32) -> i32 {
    %c0_i32 = arith.constant 0 : i32
    %c0_i32_0 = arith.constant 0 : i32
    return %c0_i32 : i32
  }
  func.func @transform_6(%arg0: i32) -> (i32, i32) {
    %c0_i32 = arith.constant 0 : i32
    %c0_i32_0 = arith.constant 0 : i32
    return %c0_i32, %arg0 : i32, i32
  }
}

</mosaic_0001>

<bundles_post_ra>
// kernel: tpu_custom_call.1
= control target key start
LH: loop header
LB: loop body
LE: loop exit
PB: predicated region body
PF: predicated region fallthrough
CT: control target
= control target key end

     0   :  { %s1556_s0 = inlined_call_operand.hbm [shape: s32[1,512], index: 0, kind: input, shape index: {}]   ;;  %s1557_s1 = inlined_call_operand.hbm [shape: s32[1,512], index: 1, kind: input, shape index: {}]   ;;  %s1558_s2 = inlined_call_operand.hbm [shape: f32[32,64], index: 2, kind: input, shape index: {}]   ;;  %s1559_s3 = inlined_call_operand.hbm [shape: f32[32,64], index: 3, kind: input, shape index: {}]   ;;  %s1560_s4 = inlined_call_operand.vmem [shape: f32[1,32], index: 4, kind: input, shape index: {}]   ;;  %s1561_s5 = inlined_call_operand.<no memory space> [shape: f32[1], index: 5, kind: input, shape index: {}]   ;;  %s1562_s6 = inlined_call_operand.hbm [shape: f32[1,512], index: 6, kind: output, shape index: {}]  }
   0x1   :  { %1564 = sst [smem:[#allocation19_spill]] %s1558_s2 }
   0x2   :  { %1565 = sst [smem:[#allocation20_spill]] %s1559_s3 }
   0x3   :  { %11 = sst [smem:[#allocation2]] %s1561_s5 }
   0x4   :  { %12 = vsyncpa [#allocation4], 0 }
   0x5   :  { %14 = vsyncpa [#allocation4 + $0x1], 0 }
   0x6   :  { %15 = vsyncpa [#allocation7], 0 }
   0x7   :  { %17 = vsyncpa [#allocation7 + $0x1], 0 }
   0x8   :  { %18 = vsyncpa [#allocation10], 0 }
   0x9   :  { %19 = vsyncpa [#allocation5], 0 }
   0xa   :  { %21 = vsyncpa [#allocation5 + $0x1], 0  ;;  %s1266_s23 = smov 0   ;;  %s1268_s24 = smov 0  }
   0xb   :  { %s1270_s25 = smov 0   ;;  %s1272_s26 = smov 0  }
   0xc LB: > { %1566 = sst [smem:[#allocation17_spill]] %s1217_s25  ;;  %s1290_s29 = sadd.s32 4294967295, %s1221_s26   ;;  %s1221_s26 = sphi %s1272_s26, %s1581_s26   ;;  %s1217_s25 = sphi %s1270_s25, %s1578_s25   ;;  %s1213_s24 = sphi %s1268_s24, %s1580_s24   ;;  %s1209_s23 = sphi %s1266_s23, %s1579_s23  }
   0xd   : > { %s1567_s2 = sld [smem:[#allocation19_spill]]  ;;  %p838_p0 = scmp.ge.s32.totalorder %s1221_s26, 1 }
   0xe   : > { %p48_p1 = scmp.eq.s32.totalorder %s1290_s29, 0  ;;  %p194_p2 = scmp.lt.s32.totalorder %s1221_s26, 3 }
   0xf   : > { %s1223_s7 = smov [#allocation8]   ;;  %s1569_s3 = sld [smem:[#allocation20_spill]] }
  0x10   : > { %p1295_p3 = pnand %p838_p0, %p194_p2  ;;  %s207_s8 = sshll.u32 %s1223_s7, 4  ;;  %s208_s8 = int_to_ptr.vmem [resolvable:$true] %s207_s8 }
  0x11   : > { %s1224_s12 = smov [#allocation9]   ;;  %s1225_s14 = smov 128  }
  0x12   : > { %p954_p4 = pneg %p1295_p3  ;;  %s221_s13 = sshll.u32 %s1224_s12, 4  ;;  %s222_s13 = int_to_ptr.vmem [resolvable:$true] %s221_s13 }
  0x13   : > { %s205_s28 = sshll.u32 %s1567_s2, 4  ;;  %s1226_s15 = smov 8   ;;  %s206_s28 = int_to_ptr.hbm [resolvable:$true] %s205_s28 }
  0x14   : > { %p955_p6 = pnand %p954_p4, %p48_p1  ;;  %s837_s16 = sadd.s32 4294967294, %s1221_s26  }
  0x15   : > { %s219_s11 = sshll.u32 %s1569_s3, 4  ;;  %s1309_s17 = sadd.s32 1, %s1221_s26   ;;  %s220_s11 = int_to_ptr.hbm [resolvable:$true] %s219_s11 }
  0x16   : > { %957 = dma.hbm_to_vmem [thread:$0]  (!%p955_p6), %s206_s28, 512, %s208_s8, [#allocation7], %s1225_s14, %s1225_s14, %s1226_s15  }
  0x17   : > { %960 = dma.hbm_to_vmem [thread:$0]  (!%p955_p6), %s220_s11, 512, %s222_s13, [#allocation10], %s1225_s14, %s1225_s14, %s1226_s15  }
  0x18   : > { %s31_s18 = ssub.s32 %s1221_s26, %s1309_s17  ;;  %s34_s19 = sadd.s32 1, %s1217_s25 }
  0x19   : > { %p32_p7 = scmp.eq.s32.totalorder %s31_s18, 0  ;;  %p41_p8 = scmp.ne.s32.totalorder %s1217_s25, %s1213_s24 }
  0x1a   : > { %p42_p9 = scmp.eq.s32.totalorder %s1221_s26, 0  ;;  %p47_p10 = scmp.ne.s32.totalorder %s1213_s24, %s1209_s23 }
  0x1b   : > { %s1320_s20 = scalar_select %p32_p7, %s1217_s25, %s34_s19  }
  0x1c   : > { %p1322_p11 = por %p42_p9, %p41_p8  ;;  %p1328_p12 = por %p48_p1, %p47_p10 }
  0x1d   : > { %1570 = sst [smem:[#allocation18_spill]] %s1320_s20  ;;  %p181_p13 = scmp.eq.s32.totalorder %s1290_s29, 1 }
  0x1e   : > { %p187_p0 = scmp.eq.s32.totalorder %s837_s16, 1  ;;  %p974_p2 = scmp.lt.s32.totalorder %s1221_s26, 2 }
  0x1f   : > { %s241_s5 = sand.u32 1, %s1217_s25   ;;  %p1335_p4 = por %p181_p13, %p41_p8 }
  0x20   : > { %p1339_p6 = por %p187_p0, %p47_p10  ;;  %s1343_s7 = sshll.u32 %s241_s5, 1 }
  0x21   : > { %s843_s8 = sshll.u32 %s1221_s26, 1  ;;  %s245_s12 = scalar_lea.vmem [#allocation3], %s1343_s7 }
  0x22   : > { %s249_s11 = scalar_lea.hbm %s1556_s0, %s843_s8  ;;  %s253_s13 = sshll.u32 %s245_s12, 4  ;;  %s254_s13 = int_to_ptr.vmem [resolvable:$true] %s253_s13 }
  0x23   : > { %s251_s14 = sshll.u32 %s249_s11, 4  ;;  %p1352_p7 = pnand %p974_p2, %p1322_p11  ;;  %s252_s14 = int_to_ptr.hbm [resolvable:$true] %s251_s14 }
  0x24   : > { %s268_s19 = scalar_lea.hbm %s1557_s1, %s843_s8  ;;  %s260_s2 = sand.u32 1, %s1221_s26  }
  0x25   : > { %s242_s3 = scalar_lea.sflag [#allocation4], %s241_s5  ;;  %s1083_s9 = sshra.s32 %s252_s14, 4  ;;  %s1084_s9 = int_to_ptr.hbm [resolvable:$true] %s1083_s9 }
  0x26   : > { %s1085_s10 = scalar_lea.hbm %s1084_s9, 2  ;;  %p1087_p9 = pneg %p1352_p7 }
  0x27   : > { %p1086_p8 = scmp.ne.s32.totalorder %s1084_s9, %s1085_s10  ;;  %s1090_s12 = scalar_lea.hbm %s1556_s0, 4 }
  0x28   : > { %p1091_p13 = scmp.lt.s32.totalorder %s1084_s9, %s1556_s0  ;;  %p1092_p0 = scmp.lt.s32.totalorder %s1090_s12, %s1085_s10 }
  0x29   : > { %p1088_p10 = pnand %p1087_p9, %p1086_p8 }
  0x2a   : > { %p1093_p2 = por %p1092_p0, %p1091_p13 }
  0x2b   : > { %p1089_p11 = pneg %p1088_p10 }
  0x2d   : > { %p1094_p5 = pnand %p1093_p2, %p1089_p11 }
  0x2f   : > { %1097 = shalt.err (!%p1094_p5)
}
  0x30   : > { %964 = dma.hbm_to_vmem [thread:$0]  (!%p1352_p7), %s252_s14, 32, %s254_s13, %s242_s3  }
  0x31   : > { %s270_s5 = sshll.u32 %s268_s19, 4  ;;  %s264_s8 = scalar_lea.vmem [#allocation6], %s1343_s7  ;;  %s271_s5 = int_to_ptr.hbm [resolvable:$true] %s270_s5 }
  0x32   : > { %s272_s20 = sshll.u32 %s264_s8, 4  ;;  %s261_s21 = scalar_lea.sflag [#allocation7], %s260_s2  ;;  %s273_s20 = int_to_ptr.vmem [resolvable:$true] %s272_s20 }
  0x33   : > { %s1113_s11 = sshra.s32 %s271_s5, 4  ;;  %s1120_s12 = scalar_lea.hbm %s1557_s1, 4  ;;  %s1114_s11 = int_to_ptr.hbm [resolvable:$true] %s1113_s11 }
  0x34   : > { %s1115_s25 = scalar_lea.hbm %s1114_s11, 2  ;;  %p1121_p5 = scmp.lt.s32.totalorder %s1114_s11, %s1557_s1 }
  0x35   : > { %p1116_p8 = scmp.ne.s32.totalorder %s1114_s11, %s1115_s25  ;;  %p1122_p13 = scmp.lt.s32.totalorder %s1120_s12, %s1115_s25 }
  0x37   : > { %p1118_p10 = pnand %p1116_p8, %p1087_p9  ;;  %p1123_p0 = por %p1122_p13, %p1121_p5 }
  0x39   : > { %p1119_p11 = pneg %p1118_p10 }
  0x3b   : > { %p1124_p2 = pnand %p1123_p0, %p1119_p11 }
  0x3d   : > { %1127 = shalt.err (!%p1124_p2)
}
  0x3e   : > { %967 = dma.hbm_to_vmem [thread:$0]  (!%p1352_p7), %s271_s5, 32, %s273_s20, %s261_s21  }
  0x3f   : > { %281 = sbr.rel (%p1295_p3) target bundleno = 425 (0x1a9), region = 44  ;;  %s1388_s2 = sand.u32 (!%p1295_p3), 1, %s1213_s24  }
  0x40   : > { %s1391_s7 = sshll.u32 (!%p1295_p3), %s1388_s2, 1  ;;  %s284_s13 = scalar_lea.sflag (!%p1295_p3), [#allocation4], %s1388_s2 }
  0x41   : > { %s287_s25 = scalar_lea.vmem (!%p1295_p3), [#allocation3], %s1391_s7 }
  0x44   : > { %1188 = dma.done.wait (%p1328_p12), %s284_s13, 32  }
  0x45   : > { %1190 = vsyncadd (%p1328_p12), %s284_s13, 4294967264  ;;  %s293_s30 = sand.u32 1, %s1290_s29   ;;  %s297_s14 = scalar_lea.vmem [#allocation6], %s1391_s7 }
  0x46   : > { %s294_s20 = scalar_lea.sflag [#allocation7], %s293_s30 }
  0x47   : > { %1192 = dma.done.wait (%p1328_p12), %s294_s20, 32  }
  0x48   : > { %1194 = vsyncadd (%p1328_p12), %s294_s20, 4294967264 }
  0x49   : > { %1196 = dma.done.wait (%p48_p1), [#allocation7], 512  }
  0x4a   : > { %1198 = vsyncadd (%p48_p1), [#allocation7], 4294966784 }
  0x4b   : > { %1200 = dma.done.wait (%p48_p1), [#allocation10], 512  }
  0x4c   : > { %1202 = vsyncadd (%p48_p1), [#allocation10], 4294966784  ;;  %v347_v0 = vlaneseq  ;;  %v346_v4 = vld [vmem:[%s297_s14] sm:$0x3]  ;;  %v345_v6 = vld [vmem:[%s287_s25] sm:$0x3] }
  0x4d   : > { %v1419_v7 = vperm.slane %v346_v4, 0  ;;  %v1421_v8 = vperm.slane %v346_v4, 1  ;;  %v1423_v9 = vperm.slane %v345_v6, 0  ;;  %v1425_v10 = vperm.slane %v345_v6, 1  ;;  %v531_v16 = vld [vmem:[#allocation9] sm:$0xff]  ;;  %v532_v18 = vld [vmem:[#allocation9 + $0x8] sm:$0xff] }
  0x4e   : > { %v1414_v1 = vshrl.u32 %v347_v0, 7  ;;  %v1227_v12 = vmov 1.0   ;;  %v456_v17 = vld [vmem:[#allocation8] sm:$0xff]  ;;  %v457_v19 = vld [vmem:[#allocation8 + $0x8] sm:$0xff]  ;;  %v533_v20 = vld [vmem:[#allocation9 + $0x10] sm:$0xff]  ;;  %s614_s19 = sld [smem:[#allocation2]] }
  0x4f   : > { %v458_v21 = vld [vmem:[#allocation8 + $0x10] sm:$0xff]  ;;  %v534_v22 = vld [vmem:[#allocation9 + $0x18] sm:$0xff]  ;;  %s937_s18 = sshll.u32 %s1290_s29, 1  ;;  %s341_s29 = scalar_lea.vmem [#allocation11], %s1391_s7 }
  0x50   : > { %v355_v2 = vadd.s32 56, %v1414_v1  ;;  %v354_v3 = vadd.s32 48, %v1414_v1  ;;  %v353_v5 = vadd.s32 40, %v1414_v1  ;;  %v352_v11 = vadd.s32 32, %v1414_v1  ;;  %v459_v23 = vld [vmem:[#allocation8 + $0x18] sm:$0xff]  ;;  %s720_s21 = scalar_lea.hbm %s1562_s6, %s937_s18  ;;  %s1523_s11 = sshll.u32 %s341_s29, 4  ;;  %s723_s11 = int_to_ptr.vmem [resolvable:$true] %s1523_s11 }
  0x51   : > { %v351_v13 = vadd.s32 24, %v1414_v1  ;;  %v350_v14 = vadd.s32 16, %v1414_v1  ;;  %v349_v15 = vadd.s32 8, %v1414_v1  ;;  %v613_v48 = vld [vmem:[%s1560_s4] sm:$0x1]  ;;  %s724_s9 = sshll.u32 %s720_s21, 4  ;;  %s725_s9 = int_to_ptr.hbm [resolvable:$true] %s724_s9 }
  0x52   : > { %vm422_vm0 = vcmp.eq.s32.totalorder %v355_v2, %v1419_v7  ;;  %vm423_vm1 = vcmp.eq.s32.totalorder %v355_v2, %v1421_v8  ;;  %vm420_vm2 = vcmp.eq.s32.totalorder %v354_v3, %v1419_v7  ;;  %vm421_vm3 = vcmp.eq.s32.totalorder %v354_v3, %v1421_v8  ;;  %s710_s10 = scalar_lea.sflag [#allocation5], %s1388_s2  ;;  %s1157_s12 = sshra.s32 %s725_s9, 4  ;;  %s1158_s12 = int_to_ptr.hbm [resolvable:$true] %s1157_s12 }
  0x53   : > { %908 = vmatpush.msk.msra.mxu2 %vm422_vm0, %v1227_v12  ;;  %920 = vmatpush.msk.msra.mxu3 %vm423_vm1, %v1227_v12  ;;  %vm372_vm4 = vcmp.eq.s32.totalorder %v355_v2, %v1423_v9  ;;  %vm418_vm5 = vcmp.eq.s32.totalorder %v353_v5, %v1419_v7  ;;  %vm419_vm6 = vcmp.eq.s32.totalorder %v353_v5, %v1421_v8  ;;  %s1159_s16 = scalar_lea.hbm %s1158_s12, 2  ;;  %s1163_s13 = scalar_lea.hbm %s1562_s6, 4 }
  0x54   : > { %884 = vmatpush.msk.msra.mxu0 %vm372_vm4, %v1227_v12  ;;  %vm373_vm7 = vcmp.eq.s32.totalorder %v355_v2, %v1425_v10  ;;  %vm370_vm8 = vcmp.eq.s32.totalorder %v354_v3, %v1423_v9  ;;  %vm371_vm9 = vcmp.eq.s32.totalorder %v354_v3, %v1425_v10  ;;  %vm416_vm10 = vcmp.eq.s32.totalorder %v352_v11, %v1419_v7  ;;  %p1160_p1 = scmp.ne.s32.totalorder %s1158_s12, %s1159_s16  ;;  %p1164_p7 = scmp.lt.s32.totalorder %s1158_s12, %s1562_s6 }
  0x55   : > { %909 = vmatpush.msk.msra.mxu2 %vm420_vm2, %v1227_v12  ;;  %921 = vmatpush.msk.msra.mxu3 %vm421_vm3, %v1227_v12  ;;  %vm417_vm11 = vcmp.eq.s32.totalorder %v352_v11, %v1421_v8  ;;  %vm368_vm12 = vcmp.eq.s32.totalorder %v353_v5, %v1423_v9  ;;  %vm369_vm13 = vcmp.eq.s32.totalorder %v353_v5, %v1425_v10  ;;  %v615_v49 = vstv %s614_s19  ;;  %p1165_p9 = scmp.lt.s32.totalorder %s1163_s13, %s1159_s16 }
  0x56   : > { %896 = vmatpush.msk.msra.mxu1 %vm373_vm7, %v1227_v12  ;;  %885 = vmatpush.msk.msra.mxu0 %vm370_vm8, %v1227_v12  ;;  %vm366_vm14 = vcmp.eq.s32.totalorder %v352_v11, %v1423_v9  ;;  %vm414_vm15 = vcmp.eq.s32.totalorder %v351_v13, %v1419_v7  ;;  %vm415_vm0 = vcmp.eq.s32.totalorder %v351_v13, %v1421_v8  ;;  %p1161_p3 = pnand %p1160_p1, %p1335_p4 }
  0x57   : > { %910 = vmatpush.msk.msra.mxu2 %vm418_vm5, %v1227_v12  ;;  %922 = vmatpush.msk.msra.mxu3 %vm419_vm6, %v1227_v12  ;;  %vm367_vm1 = vcmp.eq.s32.totalorder %v352_v11, %v1425_v10  ;;  %vm364_vm2 = vcmp.eq.s32.totalorder %v351_v13, %v1423_v9  ;;  %vm412_vm3 = vcmp.eq.s32.totalorder %v350_v14, %v1419_v7  ;;  %p1166_p8 = por %p1165_p9, %p1164_p7 }
  0x58   : > { %897 = vmatpush.msk.msra.mxu1 %vm371_vm9, %v1227_v12  ;;  %886 = vmatpush.msk.msra.mxu0 %vm368_vm12, %v1227_v12  ;;  %vm413_vm4 = vcmp.eq.s32.totalorder %v350_v14, %v1421_v8  ;;  %vm365_vm5 = vcmp.eq.s32.totalorder %v351_v13, %v1425_v10  ;;  %vm362_vm6 = vcmp.eq.s32.totalorder %v350_v14, %v1423_v9  ;;  %p1162_p12 = pneg %p1161_p3 }
  0x59   : > { %911 = vmatpush.msk.msra.mxu2 %vm416_vm10, %v1227_v12  ;;  %923 = vmatpush.msk.msra.mxu3 %vm417_vm11, %v1227_v12  ;;  %vm410_vm7 = vcmp.eq.s32.totalorder %v349_v15, %v1419_v7  ;;  %vm411_vm8 = vcmp.eq.s32.totalorder %v349_v15, %v1421_v8  ;;  %vm363_vm9 = vcmp.eq.s32.totalorder %v350_v14, %v1425_v10 }
  0x5a   : > { %898 = vmatpush.msk.msra.mxu1 %vm369_vm13, %v1227_v12  ;;  %887 = vmatpush.msk.msra.mxu0 %vm366_vm14, %v1227_v12  ;;  %vm360_vm10 = vcmp.eq.s32.totalorder %v349_v15, %v1423_v9  ;;  %vm408_vm11 = vcmp.eq.s32.totalorder %v1414_v1, %v1419_v7  ;;  %vm409_vm12 = vcmp.eq.s32.totalorder %v1414_v1, %v1421_v8  ;;  %vm460_vm13 = vcmask 523264   ;;  %p1167_p10 = pnand %p1166_p8, %p1162_p12 }
  0x5b   : > { %912 = vmatpush.msk.msra.mxu2 %vm414_vm15, %v1227_v12  ;;  %924 = vmatpush.msk.msra.mxu3 %vm415_vm0, %v1227_v12  ;;  %vm361_vm14 = vcmp.eq.s32.totalorder %v349_v15, %v1425_v10  ;;  %vm358_vm15 = vcmp.eq.s32.totalorder %v1414_v1, %v1423_v9  ;;  %vm359_vm0 = vcmp.eq.s32.totalorder %v1414_v1, %v1425_v10 }
  0x5c   : > { %899 = vmatpush.msk.msra.mxu1 %vm367_vm1, %v1227_v12  ;;  %888 = vmatpush.msk.msra.mxu0 %vm364_vm2, %v1227_v12  ;;  %vm616_vm1 = vcmask 261120  }
  0x5d   : > { %913 = vmatpush.msk.msra.mxu2 %vm412_vm3, %v1227_v12  ;;  %925 = vmatpush.msk.msra.mxu3 %vm413_vm4, %v1227_v12 }
  0x5e   : > { %900 = vmatpush.msk.msra.mxu1 %vm365_vm5, %v1227_v12  ;;  %889 = vmatpush.msk.msra.mxu0 %vm362_vm6, %v1227_v12 }
  0x5f   : > { %914 = vmatpush.msk.msra.mxu2 %vm410_vm7, %v1227_v12  ;;  %926 = vmatpush.msk.msra.mxu3 %vm411_vm8, %v1227_v12 }
  0x60   : > { %901 = vmatpush.msk.msra.mxu1 %vm363_vm9, %v1227_v12  ;;  %890 = vmatpush.msk.msra.mxu0 %vm360_vm10, %v1227_v12  ;;  %vm701_vm9 = vcmask 1040384  }
  0x61   : > { %915 = vmatpush.msk.msra.mxu2 %vm408_vm11, %v1227_v12  ;;  %927 = vmatpush.msk.msra.mxu3 %vm409_vm12, %v1227_v12  ;;  %vm706_vm11 = vcmp.lt.s32.totalorder %v347_v0, 256 }
  0x62   : > { %916 = vmatmul.msk.f32.vlgmr.msra.gmra.mxu2 %vm460_vm13, %v531_v16  ;;  %928 = vmatmul.msk.f32.vlgmr.msra.gmra.mxu3 %vm460_vm13, %v531_v16 }
  0x63   : > { %902 = vmatpush.msk.msra.mxu1 %vm361_vm14, %v1227_v12  ;;  %891 = vmatpush.msk.msra.mxu0 %vm358_vm15, %v1227_v12 }
  0x64   : > { %892 = vmatmul.msk.f32.vlgmr.msra.gmra.mxu0 %vm460_vm13, %v456_v17 }
  0x65   : > { %903 = vmatpush.msk.msra.mxu1 %vm359_vm0, %v1227_v12 }
  0x66   : > { %904 = vmatmul.msk.f32.vlgmr.msra.gmra.mxu1 %vm460_vm13, %v456_v17 }
  0x6a   : > { %917 = vmatmul.msk.f32.gmra.mxu2 %vm460_vm13, %v532_v18  ;;  %929 = vmatmul.msk.f32.gmra.mxu3 %vm460_vm13, %v532_v18 }
  0x6c   : > { %893 = vmatmul.msk.f32.gmra.mxu0 %vm460_vm13, %v457_v19 }
  0x6e   : > { %905 = vmatmul.msk.f32.gmra.mxu1 %vm460_vm13, %v457_v19 }
  0x72   : > { %918 = vmatmul.msk.f32.gmra.mxu2 %vm460_vm13, %v533_v20  ;;  %930 = vmatmul.msk.f32.gmra.mxu3 %vm460_vm13, %v533_v20 }
  0x74   : > { %894 = vmatmul.msk.f32.gmra.mxu0 %vm460_vm13, %v458_v21 }
  0x76   : > { %906 = vmatmul.msk.f32.gmra.mxu1 %vm460_vm13, %v458_v21 }
  0x7a   : > { %919 = vmatmul.msk.f32.gmra.mxu2 %vm460_vm13, %v534_v22  ;;  %931 = vmatmul.msk.f32.gmra.mxu3 %vm460_vm13, %v534_v22 }
  0x7c   : > { %895 = vmatmul.msk.f32.gmra.mxu0 %vm460_vm13, %v459_v23 }
  0x7e   : > { %907 = vmatmul.msk.f32.gmra.mxu1 %vm460_vm13, %v459_v23 }
  0xe1   : > { %v490_v24 = vpop.f32.mrf.mxu0 }
  0xe3   : > { %v519_v25 = vpop.f32.mrf.mxu1 }
  0xe5   : > { %v564_v26 = vpop.f32.mrf.mxu2  ;;  %v593_v27 = vpop.f32.mrf.mxu3 }
  0xe6   : > { %v605_v46 = vmul.f32 %v564_v26, %v490_v24  ;;  %v606_v47 = vmul.f32 %v593_v27, %v519_v25 }
  0xe9   : > { %v493_v28 = vpop.f32.mrf.mxu0 }
  0xeb   : > { %v522_v29 = vpop.f32.mrf.mxu1 }
  0xed   : > { %v567_v30 = vpop.f32.mrf.mxu2  ;;  %v596_v31 = vpop.f32.mrf.mxu3 }
  0xee   : > { %v607_v44 = vmul.f32 %v567_v30, %v493_v28  ;;  %v608_v45 = vmul.f32 %v596_v31, %v522_v29 }
  0xf1   : > { %v496_v32 = vpop.f32.mrf.mxu0 }
  0xf3   : > { %v525_v33 = vpop.f32.mrf.mxu1 }
  0xf5   : > { %v570_v34 = vpop.f32.mrf.mxu2  ;;  %v599_v35 = vpop.f32.mrf.mxu3 }
  0xf6   : > { %v609_v42 = vmul.f32 %v570_v34, %v496_v32  ;;  %v610_v43 = vmul.f32 %v599_v35, %v525_v33 }
  0xf9   : > { %v499_v36 = vpop.f32.mrf.mxu0 }
  0xfb   : > { %v528_v37 = vpop.f32.mrf.mxu1 }
  0xfd   : > { %v573_v38 = vpop.f32.mrf.mxu2  ;;  %v602_v39 = vpop.f32.mrf.mxu3 }
  0xfe   : > { %v611_v40 = vmul.f32 %v573_v38, %v499_v36  ;;  %v612_v41 = vmul.f32 %v602_v39, %v528_v37 }
 0x100   : > { %632 = vmatpush.msrb.mxu0 %v611_v40  ;;  %652 = vmatpush.msrb.mxu1 %v612_v41 }
 0x102   : > { %633 = vmatpush.msrb.mxu0 %v609_v42  ;;  %653 = vmatpush.msrb.mxu1 %v610_v43 }
 0x104   : > { %634 = vmatpush.msrb.mxu0 %v607_v44  ;;  %654 = vmatpush.msrb.mxu1 %v608_v45 }
 0x106   : > { %635 = vmatpush.msrb.mxu0 %v605_v46  ;;  %655 = vmatpush.msrb.mxu1 %v606_v47 }
 0x107   : > { %933 = vmatmul.msk.f32.vlgmr.msrb.gmra.mxu1 %vm616_vm1, %v613_v48  ;;  %932 = vmatmul.msk.f32.vlgmr.msrb.gmra.mxu0 %vm616_vm1, %v613_v48 }
 0x184   : > { %v657_v50 = vpop.f32.mrf.mxu1  ;;  %v637_v51 = vpop.f32.mrf.mxu0 }
 0x185   : > { %v658_v52 = vadd.f32 %v657_v50, %v615_v49  ;;  %v638_v53 = vadd.f32 %v637_v51, %v615_v49 }
 0x187   : > { %v935_v54 = vmul.f32 -1.442695, %v658_v52  ;;  %v934_v55 = vmul.f32 -1.442695, %v638_v53 }
 0x189   : > { %1015 = vpow2.f32 %v935_v54 }
 0x18a   : > { %1017 = vpow2.f32 %v934_v55 }
 0x18f   : > { %v1016_v56 = vpop.eup %1015 }
 0x190   : > { %v1018_v57 = vpop.eup %1017  ;;  %v667_v58 = vadd.f32 1.0, %v1016_v56 }
 0x191   : > { %v666_v59 = vadd.f32 1.0, %v1018_v57 }
 0x192   : > { %1019 = vrcp.f32 %v667_v58  ;;  %v694_v2 = vand.u32 2147483648, %v667_v58  ;;  %v692_v5 = vand.u32 2147483647, %v667_v58  ;;  %vm688_vm4 = vweird.f32 %v667_v58 }
 0x193   : > { %1021 = vrcp.f32 %v666_v59  ;;  %v679_v7 = vand.u32 2147483648, %v666_v59  ;;  %v677_v9 = vand.u32 2147483647, %v666_v59  ;;  %vm673_vm6 = vweird.f32 %v666_v59 }
 0x194   : > { %v695_v10 = vor.u32 1.1754944e-38, %v694_v2  ;;  %vm693_vm7 = vcmp.eq.f32.partialorder %v692_v5, 8.507059e+37 }
 0x195   : > { %v680_v13 = vor.u32 1.1754944e-38, %v679_v7  ;;  %vm678_vm10 = vcmp.eq.f32.partialorder %v677_v9, 8.507059e+37 }
 0x198   : > { %v1020_v60 = vpop.eup %1019 }
 0x199   : > { %v1022_v61 = vpop.eup %1021  ;;  %v684_v62 = vmul.f32 %v1020_v60, %v667_v58  ;;  %vm689_vm2 = vweird.f32 %v1020_v60 }
 0x19a   : > { %v669_v63 = vmul.f32 %v1022_v61, %v666_v59  ;;  %vm674_vm3 = vweird.f32 %v1022_v61  ;;  %vm690_vm5 = vmor %vm688_vm4, %vm689_vm2 }
 0x19b   : > { %v685_v1 = vsub.f32 1.0, %v684_v62  ;;  %vm675_vm8 = vmor %vm673_vm6, %vm674_vm3 }
 0x19c   : > { %v670_v3 = vsub.f32 1.0, %v669_v63 }
 0x19d   : > { %v686_v4 = vmul.f32 %v1020_v60, %v685_v1 }
 0x19e   : > { %v671_v6 = vmul.f32 %v1022_v61, %v670_v3 }
 0x19f   : > { %v687_v8 = vadd.f32 %v1020_v60, %v686_v4 }
 0x1a0   : > { %v672_v11 = vadd.f32 %v1022_v61, %v671_v6 }
 0x1a1   : > { %v691_v12 = vsel %vm690_vm5, %v1020_v60, %v687_v8 }
 0x1a2   : > { %v676_v14 = vsel %vm675_vm8, %v1022_v61, %v672_v11  ;;  %v696_v15 = vsel %vm693_vm7, %v695_v10, %v691_v12 }
 0x1a3   : > { %v700_v16 = vrot.slane %v696_v15, 7  ;;  %v681_v17 = vsel %vm678_vm10, %v680_v13, %v676_v14 }
 0x1a5   : > { %v702_v18 = vsel %vm701_vm9, %v681_v17, %v700_v16 }
 0x1a6   : > { %708 = vst.msk [vmem:[%s341_s29] sm:$0x3] %vm706_vm11, %v702_v18 }
 0x1a7   : > { %1170 = shalt.err (!%p1167_p10)
}
 0x1a8   : > { %952 = dma.vmem_to_hbm [thread:$0]  (%p1335_p4), %s723_s11, 32, %s725_s9, %s710_s10  }
 0x1a9 PF: > { %s736_s2 = sand.u32 1, %s1209_s23   ;;  %p1576_p11 = scmp.ge.s32.totalorder %s1221_s26, 2 }
 0x1aa   : > { %s737_s20 = scalar_lea.sflag [#allocation5], %s736_s2 }
 0x1ab   : > { %p969_p5 = pnand %p1576_p11, %p1339_p6 }
 0x1ad   : > { %p970_p13 = pneg %p969_p5 }
 0x1af   : > { %1204 = dma.done.wait (%p970_p13), %s737_s20, 32  }
 0x1b0   : > { %1206 = vsyncadd (%p970_p13), %s737_s20, 4294967264  ;;  %s1577_s14 = sld [smem:[#allocation17_spill]]  ;;  %p24_p0 = scmp.ge.s32.totalorder %s1309_s17, 4  }
 0x1b1   : > { %s1578_s25 = sld [smem:[#allocation18_spill]]  ;;  %s1579_s23 = smov %s1213_s24 }
 0x1b2   : > { %s1581_s26 = smov %s1309_s17  ;;  %26 = sbr.rel (!%p24_p0) target bundleno = 12 (0xc), region = 110 }
 0x1b6   : > { %s1580_s24 = smov %s1577_s14 }
 0x1b7   :  { %743 = vsyncpa [#allocation4], 1 }
 0x1b8   :  { %745 = vsyncpa [#allocation4 + $0x1], 1 }
 0x1b9   :  { %746 = vsyncpa [#allocation7], 1 }
 0x1ba   :  { %748 = vsyncpa [#allocation7 + $0x1], 1 }
 0x1bb   :  { %749 = vsyncpa [#allocation10], 1 }
 0x1bc   :  { %750 = vsyncpa [#allocation5], 1 }
 0x1bd   :  { %752 = vsyncpa [#allocation5 + $0x1], 1 }

</bundles_post_ra>
